<compile_context>
chip_gen: v7x
topology: tpu7x:2x2x1
jax: 0.10.0
libtpu: 0.0.40
codegen_flags: <defaults>
</compile_context>

<pallas_src>
import functools

import jax
import jax.numpy as jnp
from jax.experimental import pallas as pl
from jax.experimental.pallas import tpu as pltpu


def _fire_kernel(x_ref, wsq_ref, bsq_ref, wexp_ref, bexp_ref, mask_ref,
                 o_ref, im_ref, *, W):
    """One grid step = `G` whole images, channels on sublanes, pixels on lanes.

    x_ref    : (G, Cin, HW)        input pixels of G whole images
    wsq_ref  : (Cs, Cin)           squeeze 1x1 weights (BN folded)
    bsq_ref  : (Cs, 1)             squeeze bias (BN folded), f32
    wexp_ref : (Cout_pad, 9*Cs)    packed expand weights (1x1 branch in the
                                   centre tap, rows zero-padded 102 -> 104)
    bexp_ref : (Cout_pad, 1)       packed expand bias (zero-padded), f32
    mask_ref : (8, HW)             per-tap boundary masks (centre tap omitted),
                                   constant block -> DMA'd once for the whole grid
    o_ref    : (G, Cout_pad, HW)   cat([expand1x1, expand3x3], ch), padded rows
    im_ref   : (9*Cs, HW)          VMEM im2col scratch (reused per image)
    """
    G = x_ref.shape[0]
    Cs = wsq_ref.shape[0]
    HW = x_ref.shape[2]

    for g in range(G):  # static unroll over the (small) images-per-block count
        # --- squeeze: 1x1 conv + (folded) BN + ReLU ---------------------------
        sq = jnp.dot(wsq_ref[...], x_ref[g],
                     preferred_element_type=jnp.float32)
        sq = jnp.maximum(sq + bsq_ref[...], 0.0).astype(im_ref.dtype)  # (Cs, HW)

        # --- im2col: 9 lane-rolled, boundary-masked copies on sublanes --------
        k = 0       # tap index (dy+1)*3 + (dx+1)
        mrow = 0    # mask row (centre tap has no mask row)
        for dy in (-1, 0, 1):
            for dx in (-1, 0, 1):
                if dy == 0 and dx == 0:
                    im_ref[k * Cs:(k + 1) * Cs, :] = sq      # centre: no mask
                else:
                    s = dy * W + dx
                    shifted = pltpu.roll(sq, shift=(-s) % HW, axis=1)
                    m = mask_ref[mrow:mrow + 1, :]           # (1, HW) broadcast
                    im_ref[k * Cs:(k + 1) * Cs, :] = shifted * m
                    mrow += 1
                k += 1

        # --- expand: one packed matmul (1x1 + 3x3 + channel concat) + ReLU ----
        out = jnp.dot(wexp_ref[...], im_ref[...],
                      preferred_element_type=jnp.float32)    # (Cout_pad, HW)
        out = jnp.maximum(out + bexp_ref[...], 0.0)
        o_ref[g] = out.astype(o_ref.dtype)


def fire_m_forward(x_nchw, params, *, imgs_per_block=1,
                   compute_dtype=jnp.float32, out_dtype=None):
    """FireM forward.  Input/output are NCHW (PyTorch convention).

    imgs_per_block : whole images per grid step (must divide N).  Keep the
                     per-step pixel count around 1k-8k lanes; the grid axis is
                     "parallel" so it also load-balances across TensorCores.
    compute_dtype  : f32 (v5e, highest accuracy) or bf16 (v6e/v7x byte saver).
    out_dtype      : kernel output dtype (default: the input activation dtype);
                     bf16 halves the dominant HBM writeback stream.
    """
    N, Cin, H, W = x_nchw.shape
    HW = H * W
    if N % imgs_per_block != 0:
        raise ValueError("imgs_per_block must divide the batch size")
    G = imgs_per_block
    num_blocks = N // G
    out_dtype = x_nchw.dtype if out_dtype is None else out_dtype

    wsq = params["wsq_t"].astype(compute_dtype)      # (Cs, Cin)
    bsq = params["bsq_t"]                            # (Cs, 1)        f32
    wexp = params["wexp_t"].astype(compute_dtype)    # (Cout_pad, 9*Cs)
    bexp = params["bexp_t"]                          # (Cout_pad, 1)  f32
    Cs = wsq.shape[0]
    Cout_pad = wexp.shape[0]
    Cout = params["cout"]

    # NCHW -> (N, Cin, H*W): a free reshape, no transpose / copy.
    x3 = x_nchw.reshape(N, Cin, HW).astype(compute_dtype)

    # Tiny per-image boundary masks (8 taps; centre tap is all-ones and skipped).
    # Constant block index -> fetched once for the whole grid (O(HW) bytes total,
    # independent of batch size).
    yy, xx = jnp.meshgrid(jnp.arange(H), jnp.arange(W), indexing="ij")
    rows = []
    for dy in (-1, 0, 1):
        for dx in (-1, 0, 1):
            if dy == 0 and dx == 0:
                continue
            m = ((yy + dy >= 0) & (yy + dy < H) &
                 (xx + dx >= 0) & (xx + dx < W)).reshape(-1)
            rows.append(m.astype(compute_dtype))
    mask = jnp.stack(rows, axis=0)                   # (8, HW)

    in_bytes = N * Cin * HW * jnp.dtype(compute_dtype).itemsize
    out_bytes = N * Cout_pad * HW * jnp.dtype(out_dtype).itemsize
    cost = pl.CostEstimate(
        flops=2 * N * HW * (Cs * Cin + Cout_pad * 9 * Cs),
        transcendentals=0,
        bytes_accessed=in_bytes + out_bytes)

    out3 = pl.pallas_call(
        functools.partial(_fire_kernel, W=W),
        out_shape=jax.ShapeDtypeStruct((N, Cout_pad, HW), out_dtype),
        grid=(num_blocks,),
        in_specs=[
            pl.BlockSpec((G, Cin, HW), lambda b: (b, 0, 0)),
            pl.BlockSpec((Cs, Cin), lambda b: (0, 0)),
            pl.BlockSpec((Cs, 1), lambda b: (0, 0)),
            pl.BlockSpec((Cout_pad, 9 * Cs), lambda b: (0, 0)),
            pl.BlockSpec((Cout_pad, 1), lambda b: (0, 0)),
            pl.BlockSpec((8, HW), lambda b: (0, 0)),
        ],
        out_specs=pl.BlockSpec((G, Cout_pad, HW), lambda b: (b, 0, 0)),
        scratch_shapes=[pltpu.VMEM((9 * Cs, HW), compute_dtype)],
        compiler_params=pltpu.CompilerParams(
            dimension_semantics=("parallel",)),
        cost_estimate=cost,
    )(x3, wsq, bsq, wexp, bexp, mask)

    # (N, Cout_pad, H*W) -> NCHW; only the cheap channel slice remains.
    return out3.reshape(N, Cout_pad, H, W)[:, :Cout]


def make_params(key, in_channels, out_channels, exp_ch=(49, 53), eps=1e-5,
                pad_multiple=8):
    """Deterministic synthetic parameters; BN folded into conv weights.

    pad_multiple: output-channel padding granularity (8 = f32 sublane tile;
    use 16 for fully-tiled bf16 output stores).
    """
    keys = jax.random.split(key, 18)
    Cs, C1, C3 = out_channels, exp_ch[0], exp_ch[1]
    Cout = C1 + C3
    Cout_pad = ((Cout + pad_multiple - 1) // pad_multiple) * pad_multiple

    def rnd(k, shape, s=0.1):
        return s * jax.random.normal(k, shape, jnp.float32)

    w_sq = rnd(keys[0], (in_channels, Cs))   # 1x1 conv as (Cin, Cout)
    b_sq = rnd(keys[1], (Cs,))
    w_e1 = rnd(keys[2], (Cs, C1))            # 1x1 conv as (Cin, Cout)
    b_e1 = rnd(keys[3], (C1,))
    w_e3 = rnd(keys[4], (3, 3, Cs, C3))      # 3x3 conv as (kh, kw, Cin, Cout)
    b_e3 = rnd(keys[5], (C3,))

    def bn_fold(kg, kb, km, kv, C):
        gamma = 1.0 + 0.1 * jax.random.normal(kg, (C,), jnp.float32)
        beta = 0.1 * jax.random.normal(kb, (C,), jnp.float32)
        mean = 0.1 * jax.random.normal(km, (C,), jnp.float32)
        var = 0.5 + jnp.abs(jax.random.normal(kv, (C,), jnp.float32))
        scale = gamma * jax.lax.rsqrt(var + eps)
        return scale, beta - mean * scale

    s_sq, sh_sq = bn_fold(*keys[6:10], Cs)
    s_e1, sh_e1 = bn_fold(*keys[10:14], C1)
    s_e3, sh_e3 = bn_fold(*keys[14:18], C3)

    w_sq_f = w_sq * s_sq[None, :]
    b_sq_f = b_sq * s_sq + sh_sq
    w_e1_f = w_e1 * s_e1[None, :]
    b_e1_f = b_e1 * s_e1 + sh_e1
    w_e3_f = w_e3 * s_e3[None, None, None, :]
    b_e3_f = b_e3 * s_e3 + sh_e3

    # --- kernel-side packed / transposed / sublane-padded weights ------------
    wsq_t = jnp.transpose(w_sq_f, (1, 0))                        # (Cs, Cin)
    bsq_t = b_sq_f[:, None]                                      # (Cs, 1)
    # Packed expand weight (Cout_pad, 9*Cs): tap k = (dy+1)*3 + (dx+1);
    # 3x3 branch in rows [C1, Cout); 1x1 branch only in the centre-tap rows [0, C1).
    wexp_t = jnp.zeros((Cout_pad, 9 * Cs), jnp.float32)
    for k in range(9):
        ky, kx = divmod(k, 3)
        wexp_t = wexp_t.at[C1:Cout, k * Cs:(k + 1) * Cs].set(
            jnp.transpose(w_e3_f[ky, kx], (1, 0)))
    wexp_t = wexp_t.at[:C1, 4 * Cs:5 * Cs].set(jnp.transpose(w_e1_f, (1, 0)))
    bexp_t = jnp.zeros((Cout_pad, 1), jnp.float32)
    bexp_t = bexp_t.at[:Cout, 0].set(jnp.concatenate([b_e1_f, b_e3_f]))

    return dict(
        # kernel parameters
        wsq_t=wsq_t, bsq_t=bsq_t, wexp_t=wexp_t, bexp_t=bexp_t, cout=Cout,
        # reference (BN-folded) parameters
        w_sq=w_sq_f, b_sq=b_sq_f, w_e1=w_e1_f, b_e1=b_e1_f,
        w_e3=w_e3_f, b_e3=b_e3_f)


def fire_m_reference(x_nchw, p):
    """Pure-JAX (XLA conv) reference with the same folded parameters."""
    dn = ("NCHW", "OIHW", "NCHW")
    hi = jax.lax.Precision.HIGHEST

    w_sq = jnp.transpose(p["w_sq"], (1, 0))[:, :, None, None]
    sq = jax.lax.conv_general_dilated(x_nchw, w_sq, (1, 1), "VALID",
                                      dimension_numbers=dn, precision=hi)
    sq = jax.nn.relu(sq + p["b_sq"][None, :, None, None])

    w_e1 = jnp.transpose(p["w_e1"], (1, 0))[:, :, None, None]
    e1 = jax.lax.conv_general_dilated(sq, w_e1, (1, 1), "VALID",
                                      dimension_numbers=dn, precision=hi)
    e1 = jax.nn.relu(e1 + p["b_e1"][None, :, None, None])

    w_e3 = jnp.transpose(p["w_e3"], (3, 2, 0, 1))
    e3 = jax.lax.conv_general_dilated(sq, w_e3, (1, 1), ((1, 1), (1, 1)),
                                      dimension_numbers=dn, precision=hi)
    e3 = jax.nn.relu(e3 + p["b_e3"][None, :, None, None])

    return jnp.concatenate([e1, e3], axis=1)


if __name__ == "__main__":
    key = jax.random.PRNGKey(0)
    kx, kp = jax.random.split(key)

    N, Cin, H, W = 2, 4, 16, 16         # small shapes consistent with the module
    Cs, exp_ch = 8, (49, 53)            # FireM(in_channels=4, out_channels=8)
    Cout = exp_ch[0] + exp_ch[1]

    x = jax.random.normal(kx, (N, Cin, H, W), jnp.float32)
    params = make_params(kp, Cin, Cs, exp_ch)

    ref = fire_m_reference(x, params)

    # f32 compute, f32 output, one image per grid step (pipelined "parallel" grid).
    out1 = jax.block_until_ready(fire_m_forward(x, params, imgs_per_block=1))
    assert out1.shape == (N, Cout, H, W), out1.shape
    err1 = float(jnp.max(jnp.abs(out1 - ref)))
    assert err1 < 2e-2, f"f32-out max abs error {err1}"

    # bf16 output (halves the dominant HBM writeback stream), two images per step.
    out2 = jax.block_until_ready(
        fire_m_forward(x, params, imgs_per_block=2, out_dtype=jnp.bfloat16))
    assert out2.shape == (N, Cout, H, W), out2.shape
    err2 = float(jnp.max(jnp.abs(out2.astype(jnp.float32) - ref)))
    assert err2 < 3e-2, f"bf16-out max abs error {err2}"

    print("KERNEL_OK")
</pallas_src>

<mosaic_0001>
module attributes {stable_mosaic.version = 11 : i64} {
  func.func @_fire_kernel(%arg0: i32, %arg1: memref<1x4x256xf32, #tpu.memory_space<vmem>>, %arg2: memref<8x4xf32, #tpu.memory_space<vmem>>, %arg3: memref<8x1xf32, #tpu.memory_space<vmem>>, %arg4: memref<104x72xf32, #tpu.memory_space<vmem>>, %arg5: memref<104x1xf32, #tpu.memory_space<vmem>>, %arg6: memref<8x256xf32, #tpu.memory_space<vmem>>, %arg7: memref<1x104x256xf32, #tpu.memory_space<vmem>>, %arg8: memref<72x256xf32, #tpu.memory_space<vmem>>) attributes {dimension_semantics = [#tpu.dimension_semantics<parallel>], iteration_bounds = array<i64: 2>, scalar_prefetch = 0 : i64, scratch_operands = 1 : i64, tpu.core_type = #tpu.core_type<tc>, window_params = [{transform_indices = @transform_0, window_bounds = array<i64: 1, 4, 256>}, {pipeline_mode = #tpu.pipeline_mode<synchronous>, transform_indices = @transform_1, window_bounds = array<i64: 8, 4>}, {pipeline_mode = #tpu.pipeline_mode<synchronous>, transform_indices = @transform_2, window_bounds = array<i64: 8, 1>}, {pipeline_mode = #tpu.pipeline_mode<synchronous>, transform_indices = @transform_3, window_bounds = array<i64: 104, 72>}, {pipeline_mode = #tpu.pipeline_mode<synchronous>, transform_indices = @transform_4, window_bounds = array<i64: 104, 1>}, {pipeline_mode = #tpu.pipeline_mode<synchronous>, transform_indices = @transform_5, window_bounds = array<i64: 8, 256>}, {transform_indices = @transform_6, window_bounds = array<i64: 1, 104, 256>}]} {
    %c0 = arith.constant 0 : index
    %c0_0 = arith.constant 0 : index
    %0 = vector.load %arg2[%c0, %c0_0] : memref<8x4xf32, #tpu.memory_space<vmem>>, vector<8x4xf32>
    %c0_1 = arith.constant 0 : index
    %c0_2 = arith.constant 0 : index
    %c0_3 = arith.constant 0 : index
    %1 = vector.load %arg1[%c0_1, %c0_2, %c0_3] : memref<1x4x256xf32, #tpu.memory_space<vmem>>, vector<1x4x256xf32>
    %2 = vector.shape_cast %1 : vector<1x4x256xf32> to vector<4x256xf32>
    %cst = arith.constant dense<0.000000e+00> : vector<8x256xf32>
    %3 = tpu.matmul %0, %2, %cst {dimension_numbers = #tpu.dot_dimension_numbers<[1], [0], [0], [1], [0, 0, 1, 1], [], []>} : vector<8x4xf32>, vector<4x256xf32>, vector<8x256xf32> -> vector<8x256xf32>
    %c0_4 = arith.constant 0 : index
    %c0_5 = arith.constant 0 : index
    %4 = vector.load %arg3[%c0_4, %c0_5] : memref<8x1xf32, #tpu.memory_space<vmem>>, vector<8x1xf32>
    %5 = vector.broadcast %4 : vector<8x1xf32> to vector<8x256xf32>
    %6 = arith.addf %3, %5 : vector<8x256xf32>
    %cst_6 = arith.constant 0.000000e+00 : f32
    %7 = vector.broadcast %cst_6 : f32 to vector<8x256xf32>
    %8 = arith.maximumf %6, %7 : vector<8x256xf32>
    %c17_i32 = arith.constant 17 : i32
    %9 = tpu.dynamic_rotate %8 by %c17_i32 dim 1 : vector<8x256xf32>, i32 -> vector<8x256xf32>
    %c0_7 = arith.constant 0 : index
    %c0_8 = arith.constant 0 : index
    %10 = vector.load %arg6[%c0_7, %c0_8] : memref<8x256xf32, #tpu.memory_space<vmem>>, vector<1x256xf32>
    %11 = vector.broadcast %10 : vector<1x256xf32> to vector<8x256xf32>
    %12 = arith.mulf %9, %11 : vector<8x256xf32>
    %c0_9 = arith.constant 0 : index
    %c0_10 = arith.constant 0 : index
    %13 = vector.load %arg8[%c0_9, %c0_10] : memref<72x256xf32, #tpu.memory_space<vmem>>, vector<8x256xf32>
    tpu.vector_store %arg8[%c0_9, %c0_10], %12 {strides = array<i32>} : memref<72x256xf32, #tpu.memory_space<vmem>>, vector<8x256xf32>,
    %c16_i32 = arith.constant 16 : i32
    %14 = tpu.dynamic_rotate %8 by %c16_i32 dim 1 : vector<8x256xf32>, i32 -> vector<8x256xf32>
    %c1 = arith.constant 1 : index
    %c0_11 = arith.constant 0 : index
    %15 = vector.load %arg6[%c1, %c0_11] : memref<8x256xf32, #tpu.memory_space<vmem>>, vector<1x256xf32>
    %16 = vector.broadcast %15 : vector<1x256xf32> to vector<8x256xf32>
    %17 = arith.mulf %14, %16 : vector<8x256xf32>
    %c8 = arith.constant 8 : index
    %c0_12 = arith.constant 0 : index
    %18 = vector.load %arg8[%c8, %c0_12] : memref<72x256xf32, #tpu.memory_space<vmem>>, vector<8x256xf32>
    tpu.vector_store %arg8[%c8, %c0_12], %17 {strides = array<i32>} : memref<72x256xf32, #tpu.memory_space<vmem>>, vector<8x256xf32>,
    %c15_i32 = arith.constant 15 : i32
    %19 = tpu.dynamic_rotate %8 by %c15_i32 dim 1 : vector<8x256xf32>, i32 -> vector<8x256xf32>
    %c2 = arith.constant 2 : index
    %c0_13 = arith.constant 0 : index
    %20 = vector.load %arg6[%c2, %c0_13] : memref<8x256xf32, #tpu.memory_space<vmem>>, vector<1x256xf32>
    %21 = vector.broadcast %20 : vector<1x256xf32> to vector<8x256xf32>
    %22 = arith.mulf %19, %21 : vector<8x256xf32>
    %c16 = arith.constant 16 : index
    %c0_14 = arith.constant 0 : index
    %23 = vector.load %arg8[%c16, %c0_14] : memref<72x256xf32, #tpu.memory_space<vmem>>, vector<8x256xf32>
    tpu.vector_store %arg8[%c16, %c0_14], %22 {strides = array<i32>} : memref<72x256xf32, #tpu.memory_space<vmem>>, vector<8x256xf32>,
    %c1_i32 = arith.constant 1 : i32
    %24 = tpu.dynamic_rotate %8 by %c1_i32 dim 1 : vector<8x256xf32>, i32 -> vector<8x256xf32>
    %c3 = arith.constant 3 : index
    %c0_15 = arith.constant 0 : index
    %25 = vector.load %arg6[%c3, %c0_15] : memref<8x256xf32, #tpu.memory_space<vmem>>, vector<1x256xf32>
    %26 = vector.broadcast %25 : vector<1x256xf32> to vector<8x256xf32>
    %27 = arith.mulf %24, %26 : vector<8x256xf32>
    %c24 = arith.constant 24 : index
    %c0_16 = arith.constant 0 : index
    %28 = vector.load %arg8[%c24, %c0_16] : memref<72x256xf32, #tpu.memory_space<vmem>>, vector<8x256xf32>
    tpu.vector_store %arg8[%c24, %c0_16], %27 {strides = array<i32>} : memref<72x256xf32, #tpu.memory_space<vmem>>, vector<8x256xf32>,
    %c32 = arith.constant 32 : index
    %c0_17 = arith.constant 0 : index
    %29 = vector.load %arg8[%c32, %c0_17] : memref<72x256xf32, #tpu.memory_space<vmem>>, vector<8x256xf32>
    tpu.vector_store %arg8[%c32, %c0_17], %8 {strides = array<i32>} : memref<72x256xf32, #tpu.memory_space<vmem>>, vector<8x256xf32>,
    %c255_i32 = arith.constant 255 : i32
    %30 = tpu.dynamic_rotate %8 by %c255_i32 dim 1 : vector<8x256xf32>, i32 -> vector<8x256xf32>
    %c4 = arith.constant 4 : index
    %c0_18 = arith.constant 0 : index
    %31 = vector.load %arg6[%c4, %c0_18] : memref<8x256xf32, #tpu.memory_space<vmem>>, vector<1x256xf32>
    %32 = vector.broadcast %31 : vector<1x256xf32> to vector<8x256xf32>
    %33 = arith.mulf %30, %32 : vector<8x256xf32>
    %c40 = arith.constant 40 : index
    %c0_19 = arith.constant 0 : index
    %34 = vector.load %arg8[%c40, %c0_19] : memref<72x256xf32, #tpu.memory_space<vmem>>, vector<8x256xf32>
    tpu.vector_store %arg8[%c40, %c0_19], %33 {strides = array<i32>} : memref<72x256xf32, #tpu.memory_space<vmem>>, vector<8x256xf32>,
    %c241_i32 = arith.constant 241 : i32
    %35 = tpu.dynamic_rotate %8 by %c241_i32 dim 1 : vector<8x256xf32>, i32 -> vector<8x256xf32>
    %c5 = arith.constant 5 : index
    %c0_20 = arith.constant 0 : index
    %36 = vector.load %arg6[%c5, %c0_20] : memref<8x256xf32, #tpu.memory_space<vmem>>, vector<1x256xf32>
    %37 = vector.broadcast %36 : vector<1x256xf32> to vector<8x256xf32>
    %38 = arith.mulf %35, %37 : vector<8x256xf32>
    %c48 = arith.constant 48 : index
    %c0_21 = arith.constant 0 : index
    %39 = vector.load %arg8[%c48, %c0_21] : memref<72x256xf32, #tpu.memory_space<vmem>>, vector<8x256xf32>
    tpu.vector_store %arg8[%c48, %c0_21], %38 {strides = array<i32>} : memref<72x256xf32, #tpu.memory_space<vmem>>, vector<8x256xf32>,
    %c240_i32 = arith.constant 240 : i32
    %40 = tpu.dynamic_rotate %8 by %c240_i32 dim 1 : vector<8x256xf32>, i32 -> vector<8x256xf32>
    %c6 = arith.constant 6 : index
    %c0_22 = arith.constant 0 : index
    %41 = vector.load %arg6[%c6, %c0_22] : memref<8x256xf32, #tpu.memory_space<vmem>>, vector<1x256xf32>
    %42 = vector.broadcast %41 : vector<1x256xf32> to vector<8x256xf32>
    %43 = arith.mulf %40, %42 : vector<8x256xf32>
    %c56 = arith.constant 56 : index
    %c0_23 = arith.constant 0 : index
    %44 = vector.load %arg8[%c56, %c0_23] : memref<72x256xf32, #tpu.memory_space<vmem>>, vector<8x256xf32>
    tpu.vector_store %arg8[%c56, %c0_23], %43 {strides = array<i32>} : memref<72x256xf32, #tpu.memory_space<vmem>>, vector<8x256xf32>,
    %c239_i32 = arith.constant 239 : i32
    %45 = tpu.dynamic_rotate %8 by %c239_i32 dim 1 : vector<8x256xf32>, i32 -> vector<8x256xf32>
    %c7 = arith.constant 7 : index
    %c0_24 = arith.constant 0 : index
    %46 = vector.load %arg6[%c7, %c0_24] : memref<8x256xf32, #tpu.memory_space<vmem>>, vector<1x256xf32>
    %47 = vector.broadcast %46 : vector<1x256xf32> to vector<8x256xf32>
    %48 = arith.mulf %45, %47 : vector<8x256xf32>
    %c64 = arith.constant 64 : index
    %c0_25 = arith.constant 0 : index
    %49 = vector.load %arg8[%c64, %c0_25] : memref<72x256xf32, #tpu.memory_space<vmem>>, vector<8x256xf32>
    tpu.vector_store %arg8[%c64, %c0_25], %48 {strides = array<i32>} : memref<72x256xf32, #tpu.memory_space<vmem>>, vector<8x256xf32>,
    %c0_26 = arith.constant 0 : index
    %c0_27 = arith.constant 0 : index
    %50 = vector.load %arg4[%c0_26, %c0_27] : memref<104x72xf32, #tpu.memory_space<vmem>>, vector<104x72xf32>
    %c0_28 = arith.constant 0 : index
    %c0_29 = arith.constant 0 : index
    %51 = vector.load %arg8[%c0_28, %c0_29] : memref<72x256xf32, #tpu.memory_space<vmem>>, vector<72x256xf32>
    %cst_30 = arith.constant dense<0.000000e+00> : vector<104x256xf32>
    %52 = tpu.matmul %50, %51, %cst_30 {dimension_numbers = #tpu.dot_dimension_numbers<[1], [0], [0], [1], [0, 0, 1, 1], [], []>} : vector<104x72xf32>, vector<72x256xf32>, vector<104x256xf32> -> vector<104x256xf32>
    %c0_31 = arith.constant 0 : index
    %c0_32 = arith.constant 0 : index
    %53 = vector.load %arg5[%c0_31, %c0_32] : memref<104x1xf32, #tpu.memory_space<vmem>>, vector<104x1xf32>
    %54 = vector.broadcast %53 : vector<104x1xf32> to vector<104x256xf32>
    %55 = arith.addf %52, %54 : vector<104x256xf32>
    %cst_33 = arith.constant 0.000000e+00 : f32
    %56 = vector.broadcast %cst_33 : f32 to vector<104x256xf32>
    %57 = arith.maximumf %55, %56 : vector<104x256xf32>
    %c0_34 = arith.constant 0 : index
    %c0_35 = arith.constant 0 : index
    %c0_36 = arith.constant 0 : index
    %58 = vector.load %arg7[%c0_34, %c0_35, %c0_36] : memref<1x104x256xf32, #tpu.memory_space<vmem>>, vector<1x104x256xf32>
    %59 = vector.shape_cast %58 : vector<1x104x256xf32> to vector<104x256xf32>
    %60 = vector.shape_cast %57 : vector<104x256xf32> to vector<1x104x256xf32>
    tpu.vector_store %arg7[%c0_34, %c0_35, %c0_36], %60 {strides = array<i32>} : memref<1x104x256xf32, #tpu.memory_space<vmem>>, vector<1x104x256xf32>,
    return
  }
  func.func @transform_0(%arg0: i32) -> (i32, i32, i32) {
    %c0_i32 = arith.constant 0 : i32
    %c0_i32_0 = arith.constant 0 : i32
    %c0_i32_1 = arith.constant 0 : i32
    return %arg0, %c0_i32, %c0_i32_0 : i32, i32, i32
  }
  func.func @transform_1(%arg0: i32) -> (i32, i32) {
    %c0_i32 = arith.constant 0 : i32
    %c0_i32_0 = arith.constant 0 : i32
    %c0_i32_1 = arith.constant 0 : i32
    return %c0_i32, %c0_i32_0 : i32, i32
  }
  func.func @transform_2(%arg0: i32) -> (i32, i32) {
    %c0_i32 = arith.constant 0 : i32
    %c0_i32_0 = arith.constant 0 : i32
    %c0_i32_1 = arith.constant 0 : i32
    return %c0_i32, %c0_i32_0 : i32, i32
  }
  func.func @transform_3(%arg0: i32) -> (i32, i32) {
    %c0_i32 = arith.constant 0 : i32
    %c0_i32_0 = arith.constant 0 : i32
    %c0_i32_1 = arith.constant 0 : i32
    return %c0_i32, %c0_i32_0 : i32, i32
  }
  func.func @transform_4(%arg0: i32) -> (i32, i32) {
    %c0_i32 = arith.constant 0 : i32
    %c0_i32_0 = arith.constant 0 : i32
    %c0_i32_1 = arith.constant 0 : i32
    return %c0_i32, %c0_i32_0 : i32, i32
  }
  func.func @transform_5(%arg0: i32) -> (i32, i32) {
    %c0_i32 = arith.constant 0 : i32
    %c0_i32_0 = arith.constant 0 : i32
    %c0_i32_1 = arith.constant 0 : i32
    return %c0_i32, %c0_i32_0 : i32, i32
  }
  func.func @transform_6(%arg0: i32) -> (i32, i32, i32) {
    %c0_i32 = arith.constant 0 : i32
    %c0_i32_0 = arith.constant 0 : i32
    %c0_i32_1 = arith.constant 0 : i32
    return %arg0, %c0_i32, %c0_i32_0 : i32, i32, i32
  }
}

</mosaic_0001>

<bundles_post_ra>
// kernel: tpu_custom_call.1
= control target key start
LH: loop header
LB: loop body
LE: loop exit
PB: predicated region body
PF: predicated region fallthrough
CT: control target
= control target key end

     0   :  { %11 = vsyncpa [#allocation4], 0  ;;  %s1540_s0 = inlined_call_operand.vmem [shape: f32[2,4,256], index: 0, kind: input, shape index: {}]   ;;  %s1541_s1 = inlined_call_operand.vmem [shape: f32[8,4], index: 1, kind: input, shape index: {}]   ;;  %s1542_s2 = inlined_call_operand.vmem [shape: f32[8,1], index: 2, kind: input, shape index: {}]   ;;  %s1543_s3 = inlined_call_operand.vmem [shape: f32[104,72], index: 3, kind: input, shape index: {}]   ;;  %s1544_s4 = inlined_call_operand.vmem [shape: f32[104,1], index: 4, kind: input, shape index: {}]   ;;  %s1545_s5 = inlined_call_operand.vmem [shape: f32[8,256], index: 5, kind: input, shape index: {}]   ;;  %s1546_s6 = inlined_call_operand.hbm [shape: f32[2,104,256], index: 6, kind: output, shape index: {}]  }
   0x1   :  { %13 = vsyncpa [#allocation4 + $0x1], 0  ;;  %s1182_s21 = smov 0   ;;  %s1184_s22 = smov 0  }
   0x2   :  { %s1186_s23 = smov 0   ;;  %s1188_s24 = smov 0  }
   0x3 LB: > { %s1203_s25 = sadd.s32 4294967295, %s1133_s24   ;;  %s957_s26 = sadd.s32 4294967294, %s1133_s24   ;;  %s1133_s24 = sphi %s1188_s24, %s1552_s24   ;;  %s1129_s23 = sphi %s1186_s23, %s1551_s23   ;;  %s1125_s22 = sphi %s1184_s22, %s1550_s22   ;;  %s1121_s21 = sphi %s1182_s21, %s1549_s21  }
   0x4   : > { %s1207_s27 = sadd.s32 1, %s1133_s24   ;;  %s157_s28 = sadd.s32 1, %s1129_s23 }
   0x5   : > { %s154_s29 = ssub.s32 %s1133_s24, %s1207_s27  ;;  %p167_p0 = scmp.ne.s32.totalorder %s1129_s23, %s1125_s22 }
   0x6   : > { %p155_p1 = scmp.eq.s32.totalorder %s154_s29, 0  ;;  %p168_p2 = scmp.eq.s32.totalorder %s1203_s25, 1 }
   0x7   : > { %p173_p3 = scmp.ne.s32.totalorder %s1125_s22, %s1121_s21  ;;  %p174_p4 = scmp.eq.s32.totalorder %s957_s26, 1 }
   0x8   : > { %s1218_s30 = scalar_select %p155_p1, %s1129_s23, %s157_s28  }
   0x9   : > { %p1220_p5 = por %p168_p2, %p167_p0  ;;  %p1224_p6 = por %p174_p4, %p173_p3 }
   0xa   : > { %p960_p7 = scmp.ge.s32.totalorder %s1133_s24, 1  ;;  %p215_p8 = scmp.lt.s32.totalorder %s1133_s24, 3 }
   0xc   : > { %p216_p9 = pnand %p960_p7, %p215_p8 }
   0xd   : > { %p245_p10 = scmp.lt.s32.totalorder (!%p216_p9), %s1203_s25, 1  ;;  %v1135_v0 = vmov (!%p216_p9), 0.0   ;;  %v1136_v1 = vmov (!%p216_p9), 0   ;;  %v252_v2 = vld [vmem:[%s1542_s2] sm:$0xff] (!%p216_p9)  ;;  %vm264_vm0 = vcmask (!%p216_p9), 1043456   ;;  %vm260_vm1 = vcmask (!%p216_p9), 31744  }
   0xe   : > { %219 = sbr.rel (%p216_p9) target bundleno = 652 (0x28c), region = 44  ;;  %333 = vmatprep.mubr.f32.mxu0 (!%p216_p9), %v1135_v0  ;;  %1068 = vset.pattern.permute.xlu0 (!%p216_p9), %v1136_v1  ;;  %v250_v5 = vld [vmem:[%s1541_s1] sm:$0xff] (!%p216_p9)  ;;  %s1137_s18 = smov (!%p216_p9), 16   ;;  %v569_v13 = vld [vmem:[%s1544_s4 + $0x8] sm:$0xff] (!%p216_p9)  ;;  %v571_v14 = vld [vmem:[%s1544_s4 + $0x18] sm:$0xff] (!%p216_p9)  ;;  %v346_v26 = vlaneseq (!%p216_p9)  ;;  %vm646_vm10 = vcmask (!%p216_p9), 588800  }
   0xf   : > { %255 = vperm.xlu0 (!%p216_p9), %1068, %v252_v2   ;;  %786 = vmatprep.mubr.f32.mxu1 (!%p216_p9), %v1135_v0  ;;  %s1138_s19 = smov (!%p216_p9), 17   ;;  %s1139_s20 = smov (!%p216_p9), 15   ;;  %v573_v15 = vld [vmem:[%s1544_s4 + $0x28] sm:$0xff] (!%p216_p9)  ;;  %v575_v16 = vld [vmem:[%s1544_s4 + $0x38] sm:$0xff] (!%p216_p9)  ;;  %v568_v19 = vld [vmem:[%s1544_s4] sm:$0xff] (!%p216_p9) }
  0x10   : > { %1069 = vset.pattern.permute.xlu1 (!%p216_p9), %v1136_v1  ;;  %s1140_s26 = smov (!%p216_p9), 1   ;;  %s1141_s28 = smov (!%p216_p9), 127   ;;  %v577_v17 = vld [vmem:[%s1544_s4 + $0x48] sm:$0xff] (!%p216_p9)  ;;  %v579_v18 = vld [vmem:[%s1544_s4 + $0x58] sm:$0xff] (!%p216_p9)  ;;  %v570_v20 = vld [vmem:[%s1544_s4 + $0x10] sm:$0xff] (!%p216_p9)  ;;  %v354_v29 = vshrl.u32 (!%p216_p9), %v346_v26, 7 }
  0x11   : > { %s1142_s29 = smov (!%p216_p9), 113   ;;  %s1143_s9 = smov (!%p216_p9), 112   ;;  %v572_v21 = vld [vmem:[%s1544_s4 + $0x20] sm:$0xff] (!%p216_p9)  ;;  %v574_v22 = vld [vmem:[%s1544_s4 + $0x30] sm:$0xff] (!%p216_p9)  ;;  %v1305_v30 = vand.u32 (!%p216_p9), 127, %v346_v26 }
  0x12   : > { %s1144_s10 = smov (!%p216_p9), 111   ;;  %v576_v23 = vld [vmem:[%s1544_s4 + $0x40] sm:$0xff] (!%p216_p9)  ;;  %v578_v24 = vld [vmem:[%s1544_s4 + $0x50] sm:$0xff] (!%p216_p9)  ;;  %v1307_v32 = vsub.s32 (!%p216_p9), 0, %v354_v29  ;;  %v1309_v33 = vsub.s32 (!%p216_p9), 1, %v354_v29 }
  0x13   : > { %v580_v25 = vld [vmem:[%s1544_s4 + $0x60] sm:$0xff] (!%p216_p9)  ;;  %vm371_vm2 = vcmp.lt.s32.totalorder (!%p216_p9), %v1305_v30, 16  ;;  %vm395_vm3 = vcmp.lt.s32.totalorder (!%p216_p9), %v1305_v30, 15  ;;  %vm348_vm4 = vcmp.lt.s32.totalorder (!%p216_p9), %v1305_v30, 17  ;;  %vm419_vm5 = vcmp.lt.s32.totalorder (!%p216_p9), %v1305_v30, 1 }
  0x14   : > { %v966_v35 = vld [vmem:[%s1545_s5 + $0x1] ss:$8 sm:$0x3] (!%p216_p9)  ;;  %v351_v36 = vld [vmem:[%s1545_s5] ss:$8 sm:$0x3] (!%p216_p9) }
  0x15   : > { %s246_s11 = scalar_select %p245_p10, %s1203_s25, 1  ;;  %v968_v37 = vld [vmem:[%s1545_s5 + $0x3] ss:$8 sm:$0x3]  ;;  %v380_v38 = vrot.slane %v966_v35, %v1307_v32  ;;  %v384_v39 = vrot.slane %v966_v35, %v1309_v33  ;;  %v356_v46 = vrot.slane %v351_v36, %v1307_v32  ;;  %v360_v47 = vrot.slane %v351_v36, %v1309_v33 }
  0x16   : > { %v967_v41 = vld [vmem:[%s1545_s5 + $0x2] ss:$8 sm:$0x3]  ;;  %v969_v45 = vld [vmem:[%s1545_s5 + $0x4] ss:$8 sm:$0x3]  ;;  %v432_v48 = vrot.slane %v968_v37, %v1309_v33  ;;  %v428_v50 = vrot.slane %v968_v37, %v1307_v32 }
  0x17   : > { %s989_s12 = sshll.u32 %s246_s11, 3  ;;  %v408_v49 = vrot.slane %v967_v41, %v1309_v33  ;;  %vm445_vm6 = vcmp.lt.s32.totalorder %v1305_v30, 127  ;;  %v458_v55 = vrot.slane %v969_v45, %v1309_v33  ;;  %v404_v1 = vrot.slane %v967_v41, %v1307_v32 }
  0x18   : > { %s249_s15 = scalar_lea.vmem %s1540_s0, %s989_s12  ;;  %vm469_vm7 = vcmp.lt.s32.totalorder %v1305_v30, 113  ;;  %vm493_vm8 = vcmp.lt.s32.totalorder %v1305_v30, 112  ;;  %vm517_vm9 = vcmp.lt.s32.totalorder %v1305_v30, 111  ;;  %v538_v30 = vld [vmem:[%s1543_s3 + $0x8] sm:$0xff]  ;;  %s1017_s12 = smul.u32 3328, %s1203_s25 }
  0x19   : > { %v251_v3 = vld [vmem:[%s249_s15] sm:$0xff] }
  0x1a   : > { %v259_v4 = vcombine.high %v251_v3, %v251_v3  ;;  %s1490_s25 = scalar_lea.hbm %s1546_s6, %s1017_s12 }
  0x1c   : > { %963 = vmatprep.subr.msk.mxu0 %vm264_vm0, %v259_v4 }
  0x1d   : > { %964 = vmatpush1.msk.msra.mxu0 %vm264_vm0, %v251_v3 }
  0x1e   : > { %965 = vmatmul.mubr.msk.f32.vlgmr.msra.gmra.mrb[0].mxu0 %vm260_vm1, %v250_v5 }
  0x1f   : > { %750 = vmatprep.mubr.f32.mxu0 %v1135_v0 }
  0x8e   : > { %v256_v6 = vpop.permute.xlu0 %255 }
  0xf1   : > { %v335_v7 = vpop.f32.mrb[0].mxu0 }
  0xf2   : > { %v336_v8 = vadd.f32 %v335_v7, %v256_v6  ;;  %v337_v9 = vpop.f32.mrb[1].mxu0 }
  0xf3   : > { %v338_v11 = vadd.f32 %v337_v9, %v256_v6  ;;  %v454_v9 = vrot.slane %v969_v45, %v1307_v32 }
  0xf4   : > { %v1244_v10 = vmax.f32 %v336_v8, 0.0 }
  0xf5   : > { %v1249_v12 = vmax.f32 %v338_v11, 0.0 }
  0xf6   : > { %367 = vrot.lane.b32.xlu1 %v1244_v10, %s1137_s18  ;;  %342 = vrot.lane.b32.xlu0 %v1244_v10, %s1138_s19 }
  0xfa   : > { %391 = vrot.lane.b32.xlu1 %v1244_v10, %s1139_s20  ;;  %369 = vrot.lane.b32.xlu0 %v1249_v12, %s1137_s18 }
  0xfe   : > { %415 = vrot.lane.b32.xlu1 %v1244_v10, %s1140_s26  ;;  %393 = vrot.lane.b32.xlu0 %v1249_v12, %s1139_s20 }
 0x102   : > { %344 = vrot.lane.b32.xlu1 %v1249_v12, %s1138_s19  ;;  %417 = vrot.lane.b32.xlu0 %v1249_v12, %s1140_s26  ;;  %s1145_s19 = smov [#allocation3]  }
 0x103   : > { %s1075_s20 = sshll.u32 %s1145_s19, 4  ;;  %s1076_s20 = int_to_ptr.vmem [resolvable:$false] %s1075_s20 }
 0x104   : > { %s1077_s26 = scalar_lea.vmem %s1076_s20, 6656 }
 0x106   : > { %441 = vrot.lane.b32.xlu1 %v1244_v10, %s1141_s28  ;;  %443 = vrot.lane.b32.xlu0 %v1249_v12, %s1141_s28 }
 0x10a   : > { %465 = vrot.lane.b32.xlu1 %v1244_v10, %s1142_s29  ;;  %467 = vrot.lane.b32.xlu0 %v1249_v12, %s1142_s29 }
 0x10e   : > { %489 = vrot.lane.b32.xlu1 %v1244_v10, %s1143_s9  ;;  %491 = vrot.lane.b32.xlu0 %v1249_v12, %s1143_s9  ;;  %s242_s9 = sand.u32 1, %s1125_s22  }
 0x10f   : > { %s1498_s16 = scalar_lea.sflag [#allocation4], %s242_s9 }
 0x112   : > { %513 = vrot.lane.b32.xlu1 %v1244_v10, %s1144_s10  ;;  %515 = vrot.lane.b32.xlu0 %v1249_v12, %s1144_s10  ;;  %s1016_s10 = smul.u32 208, %s242_s9 }
 0x114   : > { %s1453_s11 = scalar_lea.vmem [#allocation3], %s1016_s10 }
 0x115   : > { %s895_s13 = sshll.u32 %s1453_s11, 4  ;;  %s1492_s13 = int_to_ptr.vmem [resolvable:$true] %s895_s13 }
 0x116   : > { %588 = vperm.xlu0 %1068, %v569_v13   ;;  %583 = vperm.xlu1 %1069, %v568_v19   ;;  %s1071_s17 = scalar_lea.vmem %s1492_s13, 3328  ;;  %p1078_p0 = scmp.lt.s32.totalorder %s1492_s13, %s1076_s20 }
 0x117   : > { %p1072_p11 = scmp.ne.s32.totalorder %s1492_s13, %s1071_s17  ;;  %p1079_p1 = scmp.lt.s32.totalorder %s1077_s26, %s1071_s17 }
 0x119   : > { %p1073_p12 = pnand %p1072_p11, %p1220_p5  ;;  %p1080_p2 = por %p1079_p1, %p1078_p0 }
 0x11a   : > { %598 = vperm.xlu0 %1068, %v571_v14   ;;  %593 = vperm.xlu1 %1069, %v570_v20  }
 0x11b   : > { %p1074_p13 = pneg %p1073_p12 }
 0x11d   : > { %p1081_p3 = pnand %p1080_p2, %p1074_p13 }
 0x11e   : > { %608 = vperm.xlu0 %1068, %v573_v15   ;;  %603 = vperm.xlu1 %1069, %v572_v21  }
 0x122   : > { %618 = vperm.xlu0 %1068, %v575_v16   ;;  %613 = vperm.xlu1 %1069, %v574_v22   ;;  %v970_v16 = vld [vmem:[%s1545_s5 + $0x5] ss:$8 sm:$0x3] }
 0x126   : > { %628 = vperm.xlu0 %1068, %v577_v17   ;;  %623 = vperm.xlu1 %1069, %v576_v23   ;;  %v478_v23 = vrot.slane %v970_v16, %v1307_v32 }
 0x12a   : > { %638 = vperm.xlu0 %1068, %v579_v18   ;;  %633 = vperm.xlu1 %1069, %v578_v24   ;;  %v971_v18 = vld [vmem:[%s1545_s5 + $0x6] ss:$8 sm:$0x3]  ;;  %v482_v24 = vrot.slane %v970_v16, %v1309_v33 }
 0x12b   : > { %v502_v26 = vrot.slane %v971_v18, %v1307_v32 }
 0x12e   : > { %643 = vperm.xlu1 %1069, %v580_v25  }
 0x168   : > { %v368_v27 = vpop.permute.xlu1 %367  ;;  %v343_v28 = vpop.permute.xlu0 %342 }
 0x16c   : > { %v392_v31 = vpop.permute.xlu1 %391  ;;  %v370_v34 = vpop.permute.xlu0 %369 }
 0x16d   : > { %v372_v43 = vsel %vm371_vm2, %v368_v27, %v370_v34  ;;  %v373_v44 = vsel %vm371_vm2, %v370_v34, %v368_v27  ;;  %v506_v27 = vrot.slane %v971_v18, %v1309_v33 }
 0x16e   : > { %v387_v51 = vmul.f32 %v380_v38, %v373_v44  ;;  %v388_v52 = vmul.f32 %v384_v39, %v372_v43 }
 0x170   : > { %v416_v40 = vpop.permute.xlu1 %415  ;;  %v394_v42 = vpop.permute.xlu0 %393 }
 0x171   : > { %v396_v56 = vsel %vm395_vm3, %v392_v31, %v394_v42  ;;  %v397_v2 = vsel %vm395_vm3, %v394_v42, %v392_v31 }
 0x172   : > { %v412_v3 = vmul.f32 %v408_v49, %v396_v56  ;;  %v411_v17 = vmul.f32 %v404_v1, %v397_v2  ;;  %v541_v56 = vld [vmem:[%s1543_s3 + $0x20] sm:$0xff] }
 0x174   : > { %v345_v53 = vpop.permute.xlu1 %344  ;;  %v418_v54 = vpop.permute.xlu0 %417 }
 0x175   : > { %v349_v57 = vsel %vm348_vm4, %v343_v28, %v345_v53  ;;  %v350_v58 = vsel %vm348_vm4, %v345_v53, %v343_v28  ;;  %v420_v59 = vsel %vm419_vm5, %v416_v40, %v418_v54  ;;  %v421_v62 = vsel %vm419_vm5, %v418_v54, %v416_v40  ;;  %v972_v28 = vld [vmem:[%s1545_s5 + $0x7] ss:$8 sm:$0x3]  ;;  %v540_v54 = vld [vmem:[%s1543_s3 + $0x18] sm:$0xff] }
 0x176   : > { %v363_v60 = vmul.f32 %v356_v46, %v350_v58  ;;  %v364_v61 = vmul.f32 %v360_v47, %v349_v57  ;;  %v436_v63 = vmul.f32 %v432_v48, %v420_v59  ;;  %v435_v8 = vmul.f32 %v428_v50, %v421_v62  ;;  %v537_v50 = vld [vmem:[%s1543_s3] sm:$0xff]  ;;  %v547_v57 = vld [vmem:[%s1543_s3 + $0x50] sm:$0xff]  ;;  %v542_v58 = vld [vmem:[%s1543_s3 + $0x28] sm:$0xff] }
 0x177   : > { %v530_v38 = vrot.slane %v972_v28, %v1309_v33  ;;  %v526_v47 = vrot.slane %v972_v28, %v1307_v32  ;;  %v543_v32 = vld [vmem:[%s1543_s3 + $0x30] sm:$0xff]  ;;  %v545_v53 = vld [vmem:[%s1543_s3 + $0x40] sm:$0xff]  ;;  %v548_v59 = vld [vmem:[%s1543_s3 + $0x58] sm:$0xff] }
 0x178   : > { %v992_v4 = vpack.c.bf16 %v387_v51, %v363_v60  ;;  %v442_v5 = vpop.permute.xlu1 %441  ;;  %v444_v6 = vpop.permute.xlu0 %443  ;;  %v990_v7 = vpack.c.bf16 %v388_v52, %v364_v61  ;;  %v994_v15 = vpack.c.bf16 %v436_v63, %v412_v3  ;;  %v996_v21 = vpack.c.bf16 %v435_v8, %v411_v17  ;;  %v544_v51 = vld [vmem:[%s1543_s3 + $0x38] sm:$0xff]  ;;  %v539_v52 = vld [vmem:[%s1543_s3 + $0x10] sm:$0xff]  ;;  %v549_v60 = vld [vmem:[%s1543_s3 + $0x60] sm:$0xff] }
 0x179   : > { %v447_v11 = vsel %vm445_vm6, %v444_v6, %v442_v5  ;;  %v446_v13 = vsel %vm445_vm6, %v442_v5, %v444_v6 }
 0x17a   : > { %v462_v14 = vmul.f32 %v458_v55, %v447_v11  ;;  %991 = vmatprep.subr.bf16.mxu0 %v990_v7  ;;  %1006 = vmatprep.subr.bf16.mxu1 %v990_v7  ;;  %v461_v22 = vmul.f32 %v454_v9, %v446_v13  ;;  %v546_v55 = vld [vmem:[%s1543_s3 + $0x48] sm:$0xff] }
 0x17b   : > { %993 = vmatpush1.bf16.msra.mxu0 %v992_v4  ;;  %1011 = vmatpush1.bf16.msra.mxu1 %v992_v4 }
 0x17c   : > { %v466_v19 = vpop.permute.xlu1 %465  ;;  %995 = vmatprep.subr.bf16.mxu0 %v994_v15  ;;  %1007 = vmatprep.subr.bf16.mxu1 %v994_v15  ;;  %v468_v20 = vpop.permute.xlu0 %467  ;;  %v998_v25 = vpack.c.bf16 %v462_v14, %v1249_v12  ;;  %v1000_v12 = vpack.c.bf16 %v461_v22, %v1244_v10 }
 0x17d   : > { %v470_v29 = vsel %vm469_vm7, %v466_v19, %v468_v20  ;;  %v471_v31 = vsel %vm469_vm7, %v468_v20, %v466_v19 }
 0x17e   : > { %v485_v39 = vmul.f32 %v478_v23, %v470_v29  ;;  %v486_v40 = vmul.f32 %v482_v24, %v471_v31 }
 0x17f   : > { %997 = vmatpush1.bf16.msra.mxu0 %v996_v21  ;;  %1012 = vmatpush1.bf16.msra.mxu1 %v996_v21 }
 0x180   : > { %v490_v34 = vpop.permute.xlu1 %489  ;;  %999 = vmatprep.subr.bf16.mxu0 %v998_v25  ;;  %1008 = vmatprep.subr.bf16.mxu1 %v998_v25  ;;  %v492_v35 = vpop.permute.xlu0 %491 }
 0x181   : > { %v494_v36 = vsel %vm493_vm8, %v490_v34, %v492_v35  ;;  %v495_v37 = vsel %vm493_vm8, %v492_v35, %v490_v34 }
 0x182   : > { %v509_v41 = vmul.f32 %v502_v26, %v494_v36  ;;  %v510_v42 = vmul.f32 %v506_v27, %v495_v37 }
 0x183   : > { %1001 = vmatpush1.bf16.msra.mxu0 %v1000_v12  ;;  %1013 = vmatpush1.bf16.msra.mxu1 %v1000_v12 }
 0x184   : > { %v1004_v43 = vpack.c.bf16 %v509_v41, %v485_v39  ;;  %v514_v44 = vpop.permute.xlu1 %513  ;;  %v516_v45 = vpop.permute.xlu0 %515  ;;  %v1002_v46 = vpack.c.bf16 %v510_v42, %v486_v40 }
 0x185   : > { %v519_v48 = vsel %vm517_vm9, %v516_v45, %v514_v44  ;;  %v518_v10 = vsel %vm517_vm9, %v514_v44, %v516_v45 }
 0x186   : > { %v534_v49 = vmul.f32 %v530_v38, %v519_v48  ;;  %1003 = vmatprep.subr.bf16.mxu0 %v1002_v46  ;;  %1009 = vmatprep.subr.bf16.mxu1 %v1002_v46  ;;  %v533_v33 = vmul.f32 %v526_v47, %v518_v10 }
 0x187   : > { %1005 = vmatpush1.bf16.msra.mxu0 %v1004_v43  ;;  %1014 = vmatpush1.bf16.msra.mxu1 %v1004_v43 }
 0x188   : > { %702 = vmatprep.subr.mxu0 %v534_v49  ;;  %1010 = vmatprep.subr.mxu1 %v534_v49 }
 0x18b   : > { %703 = vmatpush1.msra.mxu0 %v533_v33  ;;  %1015 = vmatpush1.msra.mxu1 %v533_v33 }
 0x18c   : > { %973 = vmatmul.mubr.msk.f32.vlgmr.msra.gmra.mrb[2].mxu0 %vm646_vm10, %v537_v50  ;;  %979 = vmatmul.mubr.msk.f32.vlgmr.msra.gmra.mrb[0].mxu1 %vm646_vm10, %v543_v32 }
 0x18d   : > { %756 = vmatprep.mubr.f32.mxu0 %v1135_v0  ;;  %792 = vmatprep.mubr.f32.mxu1 %v1135_v0 }
 0x190   : > { %974 = vmatmul.mubr.msk.f32.gmra.mrb[4].mxu0 %vm646_vm10, %v538_v30  ;;  %980 = vmatmul.mubr.msk.f32.gmra.mrb[2].mxu1 %vm646_vm10, %v544_v51 }
 0x191   : > { %762 = vmatprep.mubr.f32.mxu0 %v1135_v0  ;;  %798 = vmatprep.mubr.f32.mxu1 %v1135_v0 }
 0x194   : > { %975 = vmatmul.mubr.msk.f32.gmra.mrb[6].mxu0 %vm646_vm10, %v539_v52  ;;  %981 = vmatmul.mubr.msk.f32.gmra.mrb[4].mxu1 %vm646_vm10, %v545_v53 }
 0x195   : > { %768 = vmatprep.mubr.f32.mxu0 %v1135_v0  ;;  %804 = vmatprep.mubr.f32.mxu1 %v1135_v0  ;;  %v584_v61 = vpop.permute.xlu1 %583  ;;  %v589_v62 = vpop.permute.xlu0 %588 }
 0x198   : > { %976 = vmatmul.mubr.msk.f32.gmra.mrb[8].mxu0 %vm646_vm10, %v540_v54  ;;  %982 = vmatmul.mubr.msk.f32.gmra.mrb[6].mxu1 %vm646_vm10, %v546_v55 }
 0x199   : > { %774 = vmatprep.mubr.f32.mxu0 %v1135_v0  ;;  %810 = vmatprep.mubr.f32.mxu1 %v1135_v0  ;;  %v594_v63 = vpop.permute.xlu1 %593  ;;  %v1444_v1 = vpop.permute.xlu0 %598 }
 0x19c   : > { %977 = vmatmul.mubr.msk.f32.gmra.mrb[10].mxu0 %vm646_vm10, %v541_v56  ;;  %983 = vmatmul.mubr.msk.f32.gmra.mrb[8].mxu1 %vm646_vm10, %v547_v57 }
 0x19d   : > { %780 = vmatprep.mubr.f32.mxu0 %v1135_v0  ;;  %816 = vmatprep.mubr.f32.mxu1 %v1135_v0  ;;  %v1446_v2 = vpop.permute.xlu1 %603  ;;  %v1449_v3 = vpop.permute.xlu0 %608 }
 0x1a0   : > { %978 = vmatmul.mubr.msk.f32.gmra.mrb[12].mxu0 %vm646_vm10, %v542_v58  ;;  %984 = vmatmul.mubr.msk.f32.gmra.mrb[10].mxu1 %vm646_vm10, %v548_v59 }
 0x1a1   : > { %822 = vmatprep.mubr.f32.mxu1 %v1135_v0  ;;  %v614_v4 = vpop.permute.xlu1 %613  ;;  %v619_v14 = vpop.permute.xlu0 %618 }
 0x1a4   : > { %985 = vmatmul.mubr.msk.f32.gmra.mrb[12].mxu1 %vm646_vm10, %v549_v60 }
 0x1a5   : > { %v624_v27 = vpop.permute.xlu1 %623  ;;  %v629_v42 = vpop.permute.xlu0 %628 }
 0x1a9   : > { %v634_v51 = vpop.permute.xlu1 %633 }
 0x25f   : > { %v752_v0 = vpop.f32.mrb[2].mxu0  ;;  %v788_v5 = vpop.f32.mrb[0].mxu1 }
 0x260   : > { %v753_v6 = vadd.f32 %v752_v0, %v584_v61  ;;  %v789_v7 = vadd.f32 %v788_v5, %v614_v4  ;;  %v754_v8 = vpop.f32.mrb[3].mxu0  ;;  %v790_v9 = vpop.f32.mrb[1].mxu1 }
 0x261   : > { %v755_v11 = vadd.f32 %v754_v8, %v584_v61  ;;  %v791_v13 = vadd.f32 %v790_v9, %v614_v4 }
 0x262   : > { %v829_v15 = vmax.f32 %v753_v6, 0.0  ;;  %v841_v16 = vmax.f32 %v789_v7, 0.0 }
 0x263   : > { %v830_v17 = vmax.f32 %v755_v11, 0.0  ;;  %v842_v18 = vmax.f32 %v791_v13, 0.0  ;;  %v758_v19 = vpop.f32.mrb[4].mxu0  ;;  %v794_v20 = vpop.f32.mrb[2].mxu1 }
 0x264   : > { %855 = vst [vmem:[%s1453_s11] sm:$0xff] %v829_v15  ;;  %867 = vst [vmem:[%s1453_s11 + $0x60] sm:$0xff] %v841_v16  ;;  %v759_v21 = vadd.f32 %v758_v19, %v589_v62  ;;  %v795_v22 = vadd.f32 %v794_v20, %v619_v14  ;;  %v760_v23 = vpop.f32.mrb[5].mxu0  ;;  %v796_v24 = vpop.f32.mrb[3].mxu1 }
 0x265   : > { %856 = vst [vmem:[%s1453_s11 + $0x8] sm:$0xff] %v830_v17  ;;  %868 = vst [vmem:[%s1453_s11 + $0x68] sm:$0xff] %v842_v18  ;;  %v761_v25 = vadd.f32 %v760_v23, %v589_v62  ;;  %v797_v26 = vadd.f32 %v796_v24, %v619_v14  ;;  %v644_v18 = vpop.permute.xlu1 %643 }
 0x266   : > { %v831_v28 = vmax.f32 %v759_v21, 0.0  ;;  %v843_v29 = vmax.f32 %v795_v22, 0.0 }
 0x267   : > { %v832_v31 = vmax.f32 %v761_v25, 0.0  ;;  %v844_v34 = vmax.f32 %v797_v26, 0.0  ;;  %v764_v35 = vpop.f32.mrb[6].mxu0  ;;  %v800_v12 = vpop.f32.mrb[4].mxu1 }
 0x268   : > { %857 = vst [vmem:[%s1453_s11 + $0x10] sm:$0xff] %v831_v28  ;;  %869 = vst [vmem:[%s1453_s11 + $0x70] sm:$0xff] %v843_v29  ;;  %v765_v36 = vadd.f32 %v764_v35, %v594_v63  ;;  %v801_v37 = vadd.f32 %v800_v12, %v624_v27  ;;  %v766_v38 = vpop.f32.mrb[7].mxu0  ;;  %v802_v39 = vpop.f32.mrb[5].mxu1 }
 0x269   : > { %858 = vst [vmem:[%s1453_s11 + $0x18] sm:$0xff] %v832_v31  ;;  %870 = vst [vmem:[%s1453_s11 + $0x78] sm:$0xff] %v844_v34  ;;  %v767_v40 = vadd.f32 %v766_v38, %v594_v63  ;;  %v803_v41 = vadd.f32 %v802_v39, %v624_v27 }
 0x26a   : > { %v833_v43 = vmax.f32 %v765_v36, 0.0  ;;  %v845_v44 = vmax.f32 %v801_v37, 0.0 }
 0x26b   : > { %v834_v45 = vmax.f32 %v767_v40, 0.0  ;;  %v846_v46 = vmax.f32 %v803_v41, 0.0  ;;  %v770_v47 = vpop.f32.mrb[8].mxu0  ;;  %v806_v48 = vpop.f32.mrb[6].mxu1 }
 0x26c   : > { %859 = vst [vmem:[%s1453_s11 + $0x20] sm:$0xff] %v833_v43  ;;  %871 = vst [vmem:[%s1453_s11 + $0x80] sm:$0xff] %v845_v44  ;;  %v771_v10 = vadd.f32 %v770_v47, %v1444_v1  ;;  %v807_v49 = vadd.f32 %v806_v48, %v629_v42  ;;  %v772_v33 = vpop.f32.mrb[9].mxu0  ;;  %v808_v50 = vpop.f32.mrb[7].mxu1 }
 0x26d   : > { %860 = vst [vmem:[%s1453_s11 + $0x28] sm:$0xff] %v834_v45  ;;  %872 = vst [vmem:[%s1453_s11 + $0x88] sm:$0xff] %v846_v46  ;;  %v773_v32 = vadd.f32 %v772_v33, %v1444_v1  ;;  %v809_v30 = vadd.f32 %v808_v50, %v629_v42  ;;  %v639_v1 = vpop.permute.xlu0 %638 }
 0x26e   : > { %v835_v52 = vmax.f32 %v771_v10, 0.0  ;;  %v847_v53 = vmax.f32 %v807_v49, 0.0 }
 0x26f   : > { %v836_v54 = vmax.f32 %v773_v32, 0.0  ;;  %v848_v55 = vmax.f32 %v809_v30, 0.0  ;;  %v776_v56 = vpop.f32.mrb[10].mxu0  ;;  %v812_v57 = vpop.f32.mrb[8].mxu1 }
 0x270   : > { %861 = vst [vmem:[%s1453_s11 + $0x30] sm:$0xff] %v835_v52  ;;  %873 = vst [vmem:[%s1453_s11 + $0x90] sm:$0xff] %v847_v53  ;;  %v777_v58 = vadd.f32 %v776_v56, %v1446_v2  ;;  %v813_v59 = vadd.f32 %v812_v57, %v634_v51  ;;  %v778_v60 = vpop.f32.mrb[11].mxu0  ;;  %v814_v61 = vpop.f32.mrb[9].mxu1 }
 0x271   : > { %862 = vst [vmem:[%s1453_s11 + $0x38] sm:$0xff] %v836_v54  ;;  %874 = vst [vmem:[%s1453_s11 + $0x98] sm:$0xff] %v848_v55  ;;  %v779_v62 = vadd.f32 %v778_v60, %v1446_v2  ;;  %v815_v63 = vadd.f32 %v814_v61, %v634_v51 }
 0x272   : > { %v837_v4 = vmax.f32 %v777_v58, 0.0  ;;  %v849_v0 = vmax.f32 %v813_v59, 0.0 }
 0x273   : > { %v838_v5 = vmax.f32 %v779_v62, 0.0  ;;  %v850_v6 = vmax.f32 %v815_v63, 0.0  ;;  %v782_v7 = vpop.f32.mrb[12].mxu0  ;;  %v818_v8 = vpop.f32.mrb[10].mxu1 }
 0x274   : > { %863 = vst [vmem:[%s1453_s11 + $0x40] sm:$0xff] %v837_v4  ;;  %875 = vst [vmem:[%s1453_s11 + $0xa0] sm:$0xff] %v849_v0  ;;  %v783_v9 = vadd.f32 %v782_v7, %v1449_v3  ;;  %v819_v11 = vadd.f32 %v818_v8, %v639_v1  ;;  %v784_v13 = vpop.f32.mrb[13].mxu0  ;;  %v820_v14 = vpop.f32.mrb[11].mxu1 }
 0x275   : > { %864 = vst [vmem:[%s1453_s11 + $0x48] sm:$0xff] %v838_v5  ;;  %876 = vst [vmem:[%s1453_s11 + $0xa8] sm:$0xff] %v850_v6  ;;  %v785_v2 = vadd.f32 %v784_v13, %v1449_v3  ;;  %v821_v15 = vadd.f32 %v820_v14, %v639_v1 }
 0x276   : > { %v839_v16 = vmax.f32 %v783_v9, 0.0  ;;  %v851_v17 = vmax.f32 %v819_v11, 0.0 }
 0x277   : > { %v840_v19 = vmax.f32 %v785_v2, 0.0  ;;  %v852_v20 = vmax.f32 %v821_v15, 0.0  ;;  %v824_v21 = vpop.f32.mrb[12].mxu1 }
 0x278   : > { %865 = vst [vmem:[%s1453_s11 + $0x50] sm:$0xff] %v839_v16  ;;  %877 = vst [vmem:[%s1453_s11 + $0xb0] sm:$0xff] %v851_v17  ;;  %v825_v22 = vadd.f32 %v824_v21, %v644_v18  ;;  %v826_v23 = vpop.f32.mrb[13].mxu1 }
 0x279   : > { %866 = vst [vmem:[%s1453_s11 + $0x58] sm:$0xff] %v840_v19  ;;  %878 = vst [vmem:[%s1453_s11 + $0xb8] sm:$0xff] %v852_v20  ;;  %v827_v3 = vadd.f32 %v826_v23, %v644_v18 }
 0x27a   : > { %v853_v24 = vmax.f32 %v825_v22, 0.0 }
 0x27b   : > { %v854_v25 = vmax.f32 %v827_v3, 0.0 }
 0x27c   : > { %879 = vst [vmem:[%s1453_s11 + $0xc0] sm:$0xff] %v853_v24 }
 0x27d   : > { %880 = vst [vmem:[%s1453_s11 + $0xc8] sm:$0xff] %v854_v25 }
 0x27e   : > { %1084 = shalt.err (!%p1081_p3)
}
 0x27f   : > { %s1085_s28 = scalar_lea.hbm %s1490_s25, 3328  ;;  %s1089_s10 = scalar_lea.hbm %s1546_s6, 6656 }
 0x280   : > { %p1086_p4 = scmp.ne.s32.totalorder %s1490_s25, %s1085_s28  ;;  %p1090_p9 = scmp.lt.u32.totalorder %s1490_s25, %s1546_s6 }
 0x281   : > { %p1091_p10 = scmp.lt.u32.totalorder %s1089_s10, %s1085_s28  ;;  %p1093_p12 = scmp.lt.u32.totalorder %s1085_s28, %s1490_s25 }
 0x282   : > { %p1087_p7 = pnand %p1086_p4, %p1220_p5 }
 0x283   : > { %p1092_p11 = por %p1091_p10, %p1090_p9 }
 0x284   : > { %p1088_p8 = pneg %p1087_p7 }
 0x285   : > { %p1094_p13 = por %p1093_p12, %p1092_p11 }
 0x287   : > { %p1095_p0 = pnand %p1094_p13, %p1088_p8 }
 0x289   : > { %1098 = shalt.err (!%p1095_p0)
}
 0x28a   : > { %s1146_s14 = smov 256  }
 0x28b   : > { %1018 = dma.vmem_to_hbm [thread:$0]  (%p1220_p5), %s1492_s13, 3328, %s1490_s25, %s1498_s16, %s1146_s14, %s1146_s14, %s1137_s18  }
 0x28c PF: > { %p1024_p1 = scmp.ge.s32.totalorder %s1133_s24, 2  ;;  %s910_s15 = sand.u32 1, %s1121_s21  }
 0x28d   : > { %s911_s17 = scalar_lea.sflag [#allocation4], %s910_s15 }
 0x28e   : > { %p1021_p2 = pnand %p1024_p1, %p1224_p6 }
 0x290   : > { %1116 = dma.done.wait (!%p1021_p2), %s911_s17, 3328  }
 0x291   : > { %1118 = vsyncadd (!%p1021_p2), %s911_s17, 4294963968  ;;  %p16_p3 = scmp.ge.s32.totalorder %s1207_s27, 4   ;;  %s1549_s21 = smov %s1125_s22 }
 0x292   : > { %s1550_s22 = smov %s1129_s23  ;;  %s1551_s23 = smov %s1218_s30 }
 0x293   : > { %s1552_s24 = smov %s1207_s27  ;;  %18 = sbr.rel (!%p16_p3) target bundleno = 3 (0x3), region = 86 }
 0x29a   :  { %916 = vsyncpa [#allocation4], 1 }
 0x29b   :  { %918 = vsyncpa [#allocation4 + $0x1], 1 }

</bundles_post_ra>
